<compile_context>
chip_gen: v5e
topology: v5e:2x2
jax: 0.10.0
libtpu: 0.0.40
codegen_flags: <defaults>
</compile_context>

<pallas_src>
import functools

import jax
import jax.numpy as jnp
from jax import lax
from jax.experimental import pallas as pl
from jax.experimental.pallas import tpu as pltpu

SUBLANE = 8


def _round_up(n: int, m: int) -> int:
    return (n + m - 1) // m * m


def _cdiv(a: int, b: int) -> int:
    return (a + b - 1) // b


def task_head_kernel(x_ref, w1_ref, p1_ref, w2_ref, b2_ref, o_ref):
    """One batch tile of the TaskHead forward.

    x_ref : (TILE_B, D_in)   input tile (f32)
    w1_ref: (D_in, H)        first Linear weight (f32 or bf16, VMEM-resident)
    p1_ref: (3, H)           rows = [b1, gamma, beta] (f32, VMEM-resident)
    w2_ref: (H, D_out)       second Linear weight (f32 or bf16, VMEM-resident)
    b2_ref: (1, D_out)       second Linear bias (f32, VMEM-resident)
    o_ref : (TILE_B, D_out)  output tile (f32)
    """
    w1 = w1_ref[...]
    x = x_ref[...].astype(w1.dtype)

    # ---- Linear 1 ----
    h = jnp.dot(x, w1, preferred_element_type=jnp.float32)
    h = h + p1_ref[0:1, :]

    # ---- LayerNorm over the full hidden dim (eps = 1e-5, PyTorch default).
    # No padded columns exist, so no masking is needed; two-pass variance for
    # numerical robustness.
    mean = jnp.mean(h, axis=-1, keepdims=True)
    centered = h - mean
    var = jnp.mean(centered * centered, axis=-1, keepdims=True)
    h = centered * lax.rsqrt(var + 1e-5)
    h = h * p1_ref[1:2, :] + p1_ref[2:3, :]

    # ---- ReLU ----
    h = jnp.maximum(h, 0.0)

    # ---- Dropout (eval mode): identity ----
    # TODO(synk): training-mode dropout (pltpu.prng_random_bits mask) not implemented.

    # ---- Linear 2 ----
    w2 = w2_ref[...]
    o_ref[...] = (
        jnp.dot(h.astype(w2.dtype), w2, preferred_element_type=jnp.float32)
        + b2_ref[...]
    ).astype(o_ref.dtype)


def prepare_task_head_params(w1, b1, gamma, beta, w2, b2, *, compute_dtype=jnp.float32):
    """One-time parameter packing (call at module init, NOT every forward).

    Casting to compute_dtype=jnp.bfloat16 halves resident-weight VMEM / HBM
    traffic and unlocks the full bf16 MXU rate on v6e/v7x; f32 keeps parity.
    LayerNorm / bias params stay in f32.
    """
    hidden = w1.shape[1]
    p1 = jnp.stack(
        [
            jnp.reshape(b1, (hidden,)).astype(jnp.float32),
            jnp.reshape(gamma, (hidden,)).astype(jnp.float32),
            jnp.reshape(beta, (hidden,)).astype(jnp.float32),
        ],
        axis=0,
    )  # (3, H): rows = [b1, gamma, beta]
    return dict(
        w1=w1.astype(compute_dtype),
        p1=p1,
        w2=w2.astype(compute_dtype),
        b2=jnp.reshape(b2, (1, -1)).astype(jnp.float32),
    )


def task_head_forward(x, params, *, tile_b_max=512):
    """Fused TaskHead forward.

    x : (B, input_dim) float32
    params: dict from prepare_task_head_params.
    Returns (B, output_dim) float32.
    """
    B, d_in = x.shape
    w1, p1, w2, b2 = params["w1"], params["p1"], params["w2"], params["b2"]
    hidden = w1.shape[1]
    d_out = w2.shape[1]

    # --- Batch tile selection: balanced, sublane-aligned, >=2 steps when B is
    # large enough (so both v7x TensorCores get work; no-op on v5e/v6e).
    min_steps = 2 if B >= 2 * SUBLANE else 1
    n_steps = max(_cdiv(B, tile_b_max), min_steps)
    tile_b = _round_up(_cdiv(B, n_steps), SUBLANE)

    # --- VMEM budget: x/out double-buffered + single-buffered resident weights.
    w_bytes = w1.dtype.itemsize
    resident = (d_in * hidden + hidden * d_out) * w_bytes + (3 * hidden + d_out) * 4

    def footprint(tb):
        return (2 * tb * d_in * x.dtype.itemsize   # x, double-buffered
                + 2 * tb * d_out * 4               # out (f32), double-buffered
                + resident)                        # weights, single-buffered

    while tile_b > SUBLANE and footprint(tile_b) > (24 << 20):
        tile_b = _round_up(tile_b // 2, SUBLANE)
    if tile_b >= B:
        tile_b = B  # block == full batch dim is always legal
    n_steps = _cdiv(B, tile_b)

    vmem_limit = int(min(max(2 * footprint(tile_b) + (4 << 20), 32 << 20), 64 << 20))

    # Resident operands: constant block index + single pipeline buffer.
    resident_spec = functools.partial(pl.BlockSpec, pipeline_mode=pl.Buffered(1))

    out = pl.pallas_call(
        task_head_kernel,
        out_shape=jax.ShapeDtypeStruct((B, d_out), jnp.float32),
        grid_spec=pltpu.PrefetchScalarGridSpec(
            num_scalar_prefetch=0,
            grid=(n_steps,),
            in_specs=[
                # x: tiled along batch (pipelined / double-buffered).
                pl.BlockSpec((tile_b, d_in), lambda i: (i, 0)),
                # Weights / packed params: VMEM-resident, single-buffered.
                resident_spec((d_in, hidden), lambda i: (0, 0)),
                resident_spec((3, hidden), lambda i: (0, 0)),
                resident_spec((hidden, d_out), lambda i: (0, 0)),
                resident_spec((1, d_out), lambda i: (0, 0)),
            ],
            out_specs=pl.BlockSpec((tile_b, d_out), lambda i: (i, 0)),
        ),
        compiler_params=pltpu.CompilerParams(
            dimension_semantics=("parallel",),   # batch is independent -> megacore
            vmem_limit_bytes=vmem_limit,
        ),
    )(x, w1, p1, w2, b2)
    return out


def reference_forward(x, w1, b1, gamma, beta, w2, b2):
    hp = lax.Precision.HIGHEST
    h = jnp.dot(x, w1, precision=hp) + b1
    mean = jnp.mean(h, axis=-1, keepdims=True)
    var = jnp.mean((h - mean) ** 2, axis=-1, keepdims=True)
    h = (h - mean) / jnp.sqrt(var + 1e-5)
    h = h * gamma + beta
    h = jnp.maximum(h, 0.0)
    return jnp.dot(h, w2, precision=hp) + b2


if __name__ == "__main__":
    # Small shapes consistent with TaskHead(input_dim, hidden_dim, output_dim)
    batch, input_dim, hidden_dim, output_dim = 8, 32, 64, 16

    key = jax.random.PRNGKey(0)
    kx, kw1, kb1, kw2, kb2, kx2 = jax.random.split(key, 6)

    x = jax.random.normal(kx, (batch, input_dim), dtype=jnp.float32)

    # Deterministic parameter init (Kaiming-uniform-ish scale, like nn.Linear)
    lim1 = 1.0 / jnp.sqrt(input_dim)
    w1 = jax.random.uniform(kw1, (input_dim, hidden_dim), jnp.float32, -lim1, lim1)
    b1 = jax.random.uniform(kb1, (1, hidden_dim), jnp.float32, -lim1, lim1)

    gamma = jnp.ones((1, hidden_dim), jnp.float32)   # nn.LayerNorm default weight
    beta = jnp.zeros((1, hidden_dim), jnp.float32)   # nn.LayerNorm default bias

    lim2 = 1.0 / jnp.sqrt(hidden_dim)
    w2 = jax.random.uniform(kw2, (hidden_dim, output_dim), jnp.float32, -lim2, lim2)
    b2 = jax.random.uniform(kb2, (1, output_dim), jnp.float32, -lim2, lim2)

    # Parameters packed ONCE (hoisted out of the forward pass).
    params_f32 = prepare_task_head_params(w1, b1, gamma, beta, w2, b2)

    # --- Small batch (single grid step) ---
    out = jax.block_until_ready(task_head_forward(x, params_f32))
    ref = reference_forward(x, w1, b1, gamma, beta, w2, b2)
    assert out.shape == (batch, output_dim)
    assert jnp.allclose(out, ref, atol=2e-3, rtol=2e-3), "mismatch vs reference (B=8)"

    # --- Larger, non-divisible batch (multi-step grid + ragged last block) ---
    big_batch = 200
    x2 = jax.random.normal(kx2, (big_batch, input_dim), dtype=jnp.float32)
    out2 = jax.block_until_ready(task_head_forward(x2, params_f32))
    ref2 = reference_forward(x2, w1, b1, gamma, beta, w2, b2)
    assert out2.shape == (big_batch, output_dim)
    assert jnp.allclose(out2, ref2, atol=2e-3, rtol=2e-3), "mismatch vs reference (B=200)"

    # --- bf16 weight/activation MXU path (v6e/v7x perf path), looser tolerance ---
    params_bf16 = prepare_task_head_params(
        w1, b1, gamma, beta, w2, b2, compute_dtype=jnp.bfloat16)
    out3 = jax.block_until_ready(task_head_forward(x2, params_bf16))
    assert out3.shape == (big_batch, output_dim)
    assert jnp.allclose(out3, ref2, atol=5e-2, rtol=5e-2), "mismatch vs reference (bf16)"

    print("KERNEL_OK")
</pallas_src>

<mosaic_0001>
module attributes {stable_mosaic.version = 11 : i64} {
  func.func @task_head_kernel(%arg0: i32, %arg1: memref<8x32xf32, #tpu.memory_space<vmem>>, %arg2: memref<32x64xf32, #tpu.memory_space<vmem>>, %arg3: memref<3x64xf32, #tpu.memory_space<vmem>>, %arg4: memref<64x16xf32, #tpu.memory_space<vmem>>, %arg5: memref<1x16xf32, #tpu.memory_space<vmem>>, %arg6: memref<8x16xf32, #tpu.memory_space<vmem>>) attributes {dimension_semantics = [#tpu.dimension_semantics<parallel>], iteration_bounds = array<i64: 1>, scalar_prefetch = 0 : i64, scratch_operands = 0 : i64, tpu.core_type = #tpu.core_type<tc>, window_params = [{transform_indices = @transform_0, window_bounds = array<i64: 8, 32>}, {pipeline_mode = #tpu.pipeline_mode<synchronous>, transform_indices = @transform_1, window_bounds = array<i64: 32, 64>}, {pipeline_mode = #tpu.pipeline_mode<synchronous>, transform_indices = @transform_2, window_bounds = array<i64: 3, 64>}, {pipeline_mode = #tpu.pipeline_mode<synchronous>, transform_indices = @transform_3, window_bounds = array<i64: 64, 16>}, {pipeline_mode = #tpu.pipeline_mode<synchronous>, transform_indices = @transform_4, window_bounds = array<i64: 1, 16>}, {transform_indices = @transform_5, window_bounds = array<i64: 8, 16>}]} {
    %c0 = arith.constant 0 : index
    %c0_0 = arith.constant 0 : index
    %0 = vector.load %arg2[%c0, %c0_0] : memref<32x64xf32, #tpu.memory_space<vmem>>, vector<32x64xf32>
    %c0_1 = arith.constant 0 : index
    %c0_2 = arith.constant 0 : index
    %1 = vector.load %arg1[%c0_1, %c0_2] : memref<8x32xf32, #tpu.memory_space<vmem>>, vector<8x32xf32>
    %cst = arith.constant dense<0.000000e+00> : vector<8x64xf32>
    %2 = tpu.matmul %1, %0, %cst {dimension_numbers = #tpu.dot_dimension_numbers<[1], [0], [0], [1], [0, 0, 1, 1], [], []>} : vector<8x32xf32>, vector<32x64xf32>, vector<8x64xf32> -> vector<8x64xf32>
    %c0_3 = arith.constant 0 : index
    %c0_4 = arith.constant 0 : index
    %3 = vector.load %arg3[%c0_3, %c0_4] : memref<3x64xf32, #tpu.memory_space<vmem>>, vector<1x64xf32>
    %4 = vector.broadcast %3 : vector<1x64xf32> to vector<8x64xf32>
    %5 = arith.addf %2, %4 : vector<8x64xf32>
    %cst_5 = arith.constant dense<0.000000e+00> : vector<8xf32>
    %6 = vector.multi_reduction <add>, %5, %cst_5 [1] : vector<8x64xf32> to vector<8xf32>
    %7 = vector.shape_cast %6 : vector<8xf32> to vector<8x1xf32>
    %cst_6 = arith.constant 6.400000e+01 : f32
    %8 = vector.broadcast %cst_6 : f32 to vector<8x1xf32>
    %9 = arith.divf %7, %8 : vector<8x1xf32>
    %10 = vector.broadcast %9 : vector<8x1xf32> to vector<8x64xf32>
    %11 = arith.subf %5, %10 : vector<8x64xf32>
    %12 = arith.mulf %11, %11 : vector<8x64xf32>
    %cst_7 = arith.constant dense<0.000000e+00> : vector<8xf32>
    %13 = vector.multi_reduction <add>, %12, %cst_7 [1] : vector<8x64xf32> to vector<8xf32>
    %14 = vector.shape_cast %13 : vector<8xf32> to vector<8x1xf32>
    %cst_8 = arith.constant 6.400000e+01 : f32
    %15 = vector.broadcast %cst_8 : f32 to vector<8x1xf32>
    %16 = arith.divf %14, %15 : vector<8x1xf32>
    %cst_9 = arith.constant 9.99999974E-6 : f32
    %17 = vector.broadcast %cst_9 : f32 to vector<8x1xf32>
    %18 = arith.addf %16, %17 : vector<8x1xf32>
    %19 = math.rsqrt %18 : vector<8x1xf32>
    %20 = vector.broadcast %19 : vector<8x1xf32> to vector<8x64xf32>
    %21 = arith.mulf %11, %20 : vector<8x64xf32>
    %c1 = arith.constant 1 : index
    %c0_10 = arith.constant 0 : index
    %22 = vector.load %arg3[%c1, %c0_10] : memref<3x64xf32, #tpu.memory_space<vmem>>, vector<1x64xf32>
    %23 = vector.broadcast %22 : vector<1x64xf32> to vector<8x64xf32>
    %24 = arith.mulf %21, %23 : vector<8x64xf32>
    %c2 = arith.constant 2 : index
    %c0_11 = arith.constant 0 : index
    %25 = vector.load %arg3[%c2, %c0_11] : memref<3x64xf32, #tpu.memory_space<vmem>>, vector<1x64xf32>
    %26 = vector.broadcast %25 : vector<1x64xf32> to vector<8x64xf32>
    %27 = arith.addf %24, %26 : vector<8x64xf32>
    %cst_12 = arith.constant 0.000000e+00 : f32
    %28 = vector.broadcast %cst_12 : f32 to vector<8x64xf32>
    %29 = arith.maximumf %27, %28 : vector<8x64xf32>
    %c0_13 = arith.constant 0 : index
    %c0_14 = arith.constant 0 : index
    %30 = vector.load %arg4[%c0_13, %c0_14] : memref<64x16xf32, #tpu.memory_space<vmem>>, vector<64x16xf32>
    %cst_15 = arith.constant dense<0.000000e+00> : vector<8x16xf32>
    %31 = tpu.matmul %29, %30, %cst_15 {dimension_numbers = #tpu.dot_dimension_numbers<[1], [0], [0], [1], [0, 0, 1, 1], [], []>} : vector<8x64xf32>, vector<64x16xf32>, vector<8x16xf32> -> vector<8x16xf32>
    %c0_16 = arith.constant 0 : index
    %c0_17 = arith.constant 0 : index
    %32 = vector.load %arg5[%c0_16, %c0_17] : memref<1x16xf32, #tpu.memory_space<vmem>>, vector<1x16xf32>
    %33 = vector.broadcast %32 : vector<1x16xf32> to vector<8x16xf32>
    %34 = arith.addf %31, %33 : vector<8x16xf32>
    %c0_18 = arith.constant 0 : index
    %c0_19 = arith.constant 0 : index
    %35 = vector.load %arg6[%c0_18, %c0_19] : memref<8x16xf32, #tpu.memory_space<vmem>>, vector<8x16xf32>
    tpu.vector_store %arg6[%c0_18, %c0_19], %34 {strides = array<i32>} : memref<8x16xf32, #tpu.memory_space<vmem>>, vector<8x16xf32>,
    return
  }
  func.func @transform_0(%arg0: i32) -> (i32, i32) {
    %c0_i32 = arith.constant 0 : i32
    %c0_i32_0 = arith.constant 0 : i32
    return %arg0, %c0_i32 : i32, i32
  }
  func.func @transform_1(%arg0: i32) -> (i32, i32) {
    %c0_i32 = arith.constant 0 : i32
    %c0_i32_0 = arith.constant 0 : i32
    %c0_i32_1 = arith.constant 0 : i32
    return %c0_i32, %c0_i32_0 : i32, i32
  }
  func.func @transform_2(%arg0: i32) -> (i32, i32) {
    %c0_i32 = arith.constant 0 : i32
    %c0_i32_0 = arith.constant 0 : i32
    %c0_i32_1 = arith.constant 0 : i32
    return %c0_i32, %c0_i32_0 : i32, i32
  }
  func.func @transform_3(%arg0: i32) -> (i32, i32) {
    %c0_i32 = arith.constant 0 : i32
    %c0_i32_0 = arith.constant 0 : i32
    %c0_i32_1 = arith.constant 0 : i32
    return %c0_i32, %c0_i32_0 : i32, i32
  }
  func.func @transform_4(%arg0: i32) -> (i32, i32) {
    %c0_i32 = arith.constant 0 : i32
    %c0_i32_0 = arith.constant 0 : i32
    %c0_i32_1 = arith.constant 0 : i32
    return %c0_i32, %c0_i32_0 : i32, i32
  }
  func.func @transform_5(%arg0: i32) -> (i32, i32) {
    %c0_i32 = arith.constant 0 : i32
    %c0_i32_0 = arith.constant 0 : i32
    return %arg0, %c0_i32 : i32, i32
  }
}

</mosaic_0001>

<bundles_post_ra>
// kernel: tpu_custom_call.1
= control target key start
LH: loop header
LB: loop body
LE: loop exit
PB: predicated region body
PF: predicated region fallthrough
CT: control target
= control target key end

     0   :  { %s269_s0 = inlined_call_operand.vmem [shape: f32[8,32], index: 0, kind: input, shape index: {}]   ;;  %s270_s1 = inlined_call_operand.vmem [shape: f32[32,64], index: 1, kind: input, shape index: {}]   ;;  %s271_s2 = inlined_call_operand.vmem [shape: f32[3,64], index: 2, kind: input, shape index: {}]   ;;  %s272_s3 = inlined_call_operand.vmem [shape: f32[64,16], index: 3, kind: input, shape index: {}]   ;;  %s273_s4 = inlined_call_operand.vmem [shape: f32[1,16], index: 4, kind: input, shape index: {}]   ;;  %s274_s5 = inlined_call_operand.hbm [shape: f32[8,16], index: 5, kind: output, shape index: {}]  }
   0x1   :  { %v24_v0 = vld [vmem:[%s270_s1 + $0x18] sm:$0xff]  ;;  %v23_v1 = vld [vmem:[%s270_s1 + $0x10] sm:$0xff]  ;;  %v22_v2 = vld [vmem:[%s270_s1 + $0x8] sm:$0xff] }
   0x2   :  { %44 = vmatpush.msra.mxu0 %v24_v0 }
   0x4   :  { %45 = vmatpush.msra.mxu0 %v23_v1 }
   0x5   :  { %10 = vsyncpa [#allocation3], 0  ;;  %v21_v3 = vld [vmem:[%s270_s1] sm:$0xff]  ;;  %vm28_vm0 = vcmask 261120   ;;  %vm52_vm1 = vcmask 523264   ;;  %v180_v9 = vmov 64.0  }
   0x6   :  { %46 = vmatpush.msra.mxu0 %v22_v2  ;;  %v25_v4 = vld [vmem:[%s269_s0] sm:$0xff]  ;;  %150 = vrcp.f32 %v180_v9  ;;  %v96_v21 = vld [vmem:[%s272_s3 + $0x38] sm:$0xff]  ;;  %v95_v22 = vld [vmem:[%s272_s3 + $0x30] sm:$0xff]  ;;  %s181_s24 = smov [#allocation2]   ;;  %s133_s28 = sshll.u32 %s274_s5, 4  ;;  %vm124_vm6 = vcmask 130048   ;;  %s134_s28 = int_to_ptr.hbm [resolvable:$true] %s133_s28 }
   0x7   :  { %v146_v5 = vld [vmem:[%s271_s2] ss:$0 sm:$0xff]  ;;  %112 = vmatpush.msra.mxu1 %v96_v21  ;;  %v94_v23 = vld [vmem:[%s272_s3 + $0x28] sm:$0xff]  ;;  %v92_v25 = vld [vmem:[%s272_s3 + $0x18] sm:$0xff]  ;;  %s131_s25 = sshll.u32 %s181_s24, 4  ;;  %s132_s25 = int_to_ptr.vmem [resolvable:$true] %s131_s25 }
   0x8   :  { %47 = vmatpush.msra.mxu0 %v21_v3  ;;  %v93_v24 = vld [vmem:[%s272_s3 + $0x20] sm:$0xff]  ;;  %v91_v26 = vld [vmem:[%s272_s3 + $0x10] sm:$0xff]  ;;  %v90_v27 = vld [vmem:[%s272_s3 + $0x8] sm:$0xff] }
   0x9   :  { %142 = vmatmul.msk.f32.vlgmr.msra.gmra.mxu0 %vm28_vm0, %v25_v4  ;;  %113 = vmatpush.msra.mxu1 %v95_v22  ;;  %v89_v28 = vld [vmem:[%s272_s3] sm:$0xff] }
   0xa   :  { %v147_v38 = vld [vmem:[%s271_s2 + $0x1] ss:$0 sm:$0xff]  ;;  %v148_v41 = vld [vmem:[%s271_s2 + $0x2] ss:$0 sm:$0xff]  ;;  %v149_v45 = vld [vmem:[%s273_s4] ss:$0 sm:$0xff] }
   0xb   :  { %114 = vmatpush.msra.mxu1 %v94_v23 }
   0xc   :  { %v151_v10 = vpop.eup %150 }
   0xd   :  { %v57_v11 = vmul.f32 64.0, %v151_v10  ;;  %vm61_vm2 = vweird.f32 %v151_v10  ;;  %115 = vmatpush.msra.mxu1 %v93_v24 }
   0xf   :  { %v58_v12 = vsub.f32 1.0, %v57_v11  ;;  %116 = vmatpush.msra.mxu1 %v92_v25 }
  0x11   :  { %v59_v13 = vmul.f32 %v151_v10, %v58_v12  ;;  %117 = vmatpush.msra.mxu1 %v91_v26 }
  0x13   :  { %v60_v14 = vadd.f32 %v151_v10, %v59_v13  ;;  %118 = vmatpush.msra.mxu1 %v90_v27 }
  0x15   :  { %v62_v15 = vsel %vm61_vm2, %v151_v10, %v60_v14  ;;  %119 = vmatpush.msra.mxu1 %v89_v28 }
  0x86   :  { %v49_v6 = vpop.f32.mrf.mxu0 }
  0x87   :  { %v50_v7 = vadd.f32 %v146_v5, %v49_v6 }
  0x89   :  { %v53_v8 = vsel %vm52_vm1, %v50_v7, 0.0 }
  0x8a   :  { %54 = vadd.xlane.f32.xlu0 %v53_v8 }
  0xfd   :  { %v55_v16 = vpop.xlane.xlu0 %54 }
  0xfe   :  { %v63_v17 = vmul.f32 %v62_v15, %v55_v16 }
 0x100   :  { %v64_v18 = vsub.f32 %v50_v7, %v63_v17 }
 0x102   :  { %v65_v19 = vmul.f32 %v64_v18, %v64_v18 }
 0x104   :  { %v66_v20 = vsel %vm52_vm1, %v65_v19, 0.0 }
 0x105   :  { %67 = vadd.xlane.f32.xlu0 %v66_v20 }
 0x178   :  { %v68_v29 = vpop.xlane.xlu0 %67 }
 0x179   :  { %v69_v30 = vmul.f32 %v68_v29, %v62_v15 }
 0x17b   :  { %v70_v31 = vadd.f32 1e-05, %v69_v30 }
 0x17d   :  { %152 = vrsqrt.f32 %v70_v31  ;;  %vm77_vm4 = vweird.f32 %v70_v31 }
 0x183   :  { %v153_v32 = vpop.eup %152 }
 0x184   :  { %v72_v33 = vmul.f32 %v153_v32, %v70_v31  ;;  %vm78_vm3 = vweird.f32 %v153_v32 }
 0x185   :  { %vm79_vm5 = vmor %vm77_vm4, %vm78_vm3 }
 0x186   :  { %v73_v34 = vmul.f32 %v153_v32, %v72_v33 }
 0x188   :  { %v74_v35 = vmul.f32 0.5, %v73_v34 }
 0x18a   :  { %v75_v36 = vsub.f32 1.5, %v74_v35 }
 0x18c   :  { %v76_v37 = vmul.f32 %v153_v32, %v75_v36 }
 0x18e   :  { %v80_v39 = vsel %vm79_vm5, %v153_v32, %v76_v37 }
 0x18f   :  { %v81_v40 = vmul.f32 %v80_v39, %v64_v18 }
 0x191   :  { %v84_v42 = vmul.f32 %v147_v38, %v81_v40 }
 0x193   :  { %v87_v43 = vadd.f32 %v148_v41, %v84_v42 }
 0x195   :  { %v88_v44 = vmax.f32 %v87_v43, 0.0 }
 0x197   :  { %143 = vmatmul.msk.f32.vlgmr.msra.gmra.mxu1 %vm52_vm1, %v88_v44 }
 0x214   :  { %v121_v46 = vpop.f32.mrf.mxu1 }
 0x215   :  { %v122_v47 = vadd.f32 %v149_v45, %v121_v46 }
 0x217   :  { %125 = vst.msk [vmem:[#allocation2] sm:$0xff] %vm124_vm6, %v122_v47 }
 0x218   :  { %136 = dma.vmem_to_hbm [thread:$0]  %s132_s25, 128, %s134_s28, [#allocation3]  }
 0x219   :  { %178 = dma.done.wait [#allocation3], 128  }
 0x21a   :  { %179 = vsyncadd [#allocation3], 4294967168 }
 0x21b   :  { %141 = vsyncpa [#allocation3], 1 }

</bundles_post_ra>
